<compile_context>
chip_gen: v6e
topology: v6e:2x2x1
jax: 0.10.0
libtpu: 0.0.40
codegen_flags: <defaults>
</compile_context>

<pallas_src>
import jax
import jax.numpy as jnp
from jax.experimental import pallas as pl
from jax.experimental.pallas import tpu as pltpu


def _self_attention_kernel(x_ref, wq_ref, wk_ref, wv_ref,
                           bq_ref, bk_ref, bv_ref, o_ref):
    tb, s, d = x_ref.shape

    # Fold (batch, seq) into the M dimension for the projections.
    # (TB, S, D) -> (TB*S, D) is a leading-dim collapse: same vreg tiling, ~free.
    x2 = x_ref[...].reshape(tb * s, d)

    # Q/K/V projections. Weights arrive pre-transposed as (in, out), so this is a
    # plain lane-contiguous MXU matmul; biases are (1, D) and broadcast over rows.
    q = jnp.dot(x2, wq_ref[...], preferred_element_type=jnp.float32) + bq_ref[...]
    k = jnp.dot(x2, wk_ref[...], preferred_element_type=jnp.float32) + bk_ref[...]
    v = jnp.dot(x2, wv_ref[...], preferred_element_type=jnp.float32) + bv_ref[...]

    # Back to per-batch-element layout for the attention matmuls (leading split, ~free).
    q = q.reshape(tb, s, d)
    k = k.reshape(tb, s, d)
    v = v.reshape(tb, s, d)

    # attention_scores = q @ k^T, contracting the last dims directly
    # (batched dot_general -- no materialized transpose of k).
    scores = jnp.einsum("bqd,bkd->bqk", q, k, preferred_element_type=jnp.float32)

    # Softmax over the last dim (f32 throughout; keeps v5e's VPU/EUP happy).
    m = jnp.max(scores, axis=-1, keepdims=True)
    e = jnp.exp(scores - m)
    denom = jnp.sum(e, axis=-1, keepdims=True)
    # approx=False keeps exact f32 parity with the reference; use approx=True in
    # production to push the reciprocal onto the otherwise-idle EUP slot.
    probs = e * pl.reciprocal(denom, approx=False)

    # output = probs @ v   -> (TB, S, D)
    out = jnp.einsum("bqk,bkd->bqd", probs, v, preferred_element_type=jnp.float32)
    o_ref[...] = out.astype(o_ref.dtype)


def self_attention(x, wq, wk, wv, bq, bk, bv, *, batch_block=8):
    """x: (B, S, D); wq/wk/wv: (D, D) PyTorch (out, in) layout; bq/bk/bv: (D,)."""
    B, S, D = x.shape

    # Pick TB batch elements per grid step (divisor of B) to amortize per-step overhead.
    tb = min(batch_block, B)
    while B % tb:
        tb -= 1

    # One-time XLA-side transpose: (out, in) -> (in, out). Grid-invariant, paid once,
    # keeps every in-kernel weight operand lane-dense with no per-step XLU work.
    wq_t = jnp.transpose(wq)
    wk_t = jnp.transpose(wk)
    wv_t = jnp.transpose(wv)

    # Biases as 2-D (1, D): broadcast against (TB*S, D) without a 1-D vector relayout.
    bq2 = bq.reshape(1, D)
    bk2 = bk.reshape(1, D)
    bv2 = bv.reshape(1, D)

    # NOTE: weights/biases are grid-invariant; at large D add pipeline_mode=pl.Buffered(1)
    # (single buffer) and/or a K-tiling grid axis to bound their VMEM footprint. At D=32
    # the default double-buffer costs ~12 KiB, so we keep the default for simplicity.
    grid_spec = pltpu.PrefetchScalarGridSpec(
        num_scalar_prefetch=0,
        grid=(B // tb,),
        in_specs=[
            pl.BlockSpec((tb, S, D), lambda b: (b, 0, 0)),   # x  (TB batch elems / step)
            pl.BlockSpec((D, D), lambda b: (0, 0)),          # Wq^T
            pl.BlockSpec((D, D), lambda b: (0, 0)),          # Wk^T
            pl.BlockSpec((D, D), lambda b: (0, 0)),          # Wv^T
            pl.BlockSpec((1, D), lambda b: (0, 0)),          # bq
            pl.BlockSpec((1, D), lambda b: (0, 0)),          # bk
            pl.BlockSpec((1, D), lambda b: (0, 0)),          # bv
        ],
        out_specs=pl.BlockSpec((tb, S, D), lambda b: (b, 0, 0)),
    )

    return pl.pallas_call(
        _self_attention_kernel,
        out_shape=jax.ShapeDtypeStruct((B, S, D), x.dtype),
        grid_spec=grid_spec,
        compiler_params=pltpu.CompilerParams(
            # Batch axis is embarrassingly parallel: shards across the 2 TCs on v7x,
            # neutral on v5e/v6e.
            dimension_semantics=("parallel",)),
    )(x, wq_t, wk_t, wv_t, bq2, bk2, bv2)


def init_params(key, input_dim):
    """Deterministic init mirroring nn.Linear default (uniform +/- 1/sqrt(fan_in))."""
    bound = 1.0 / jnp.sqrt(jnp.float32(input_dim))
    keys = jax.random.split(key, 6)
    wq = jax.random.uniform(keys[0], (input_dim, input_dim), jnp.float32, -bound, bound)
    wk = jax.random.uniform(keys[1], (input_dim, input_dim), jnp.float32, -bound, bound)
    wv = jax.random.uniform(keys[2], (input_dim, input_dim), jnp.float32, -bound, bound)
    bq = jax.random.uniform(keys[3], (input_dim,), jnp.float32, -bound, bound)
    bk = jax.random.uniform(keys[4], (input_dim,), jnp.float32, -bound, bound)
    bv = jax.random.uniform(keys[5], (input_dim,), jnp.float32, -bound, bound)
    return wq, wk, wv, bq, bk, bv


def reference(x, wq, wk, wv, bq, bk, bv):
    q = x @ wq.T + bq
    k = x @ wk.T + bk
    v = x @ wv.T + bv
    scores = jnp.einsum("bsd,btd->bst", q, k)
    probs = jax.nn.softmax(scores, axis=-1)
    return jnp.einsum("bst,btd->bsd", probs, v)


if __name__ == "__main__":
    key = jax.random.PRNGKey(0)
    k_x, k_p = jax.random.split(key)

    B, S, D = 2, 8, 32
    x = jax.random.normal(k_x, (B, S, D), dtype=jnp.float32)
    wq, wk, wv, bq, bk, bv = init_params(k_p, D)

    out = self_attention(x, wq, wk, wv, bq, bk, bv)
    out = jax.block_until_ready(out)

    ref = reference(x, wq, wk, wv, bq, bk, bv)
    assert out.shape == (B, S, D)
    assert jnp.allclose(out, ref, atol=1e-4, rtol=1e-4)

    print("KERNEL_OK")
</pallas_src>

<mosaic_0001>
module attributes {stable_mosaic.version = 11 : i64} {
  func.func @_self_attention_kernel(%arg0: i32, %arg1: memref<2x8x32xf32, #tpu.memory_space<vmem>>, %arg2: memref<32x32xf32, #tpu.memory_space<vmem>>, %arg3: memref<32x32xf32, #tpu.memory_space<vmem>>, %arg4: memref<32x32xf32, #tpu.memory_space<vmem>>, %arg5: memref<1x32xf32, #tpu.memory_space<vmem>>, %arg6: memref<1x32xf32, #tpu.memory_space<vmem>>, %arg7: memref<1x32xf32, #tpu.memory_space<vmem>>, %arg8: memref<2x8x32xf32, #tpu.memory_space<vmem>>) attributes {dimension_semantics = [#tpu.dimension_semantics<parallel>], iteration_bounds = array<i64: 1>, scalar_prefetch = 0 : i64, scratch_operands = 0 : i64, tpu.core_type = #tpu.core_type<tc>, window_params = [{transform_indices = @transform_0, window_bounds = array<i64: 2, 8, 32>}, {pipeline_mode = #tpu.pipeline_mode<synchronous>, transform_indices = @transform_1, window_bounds = array<i64: 32, 32>}, {pipeline_mode = #tpu.pipeline_mode<synchronous>, transform_indices = @transform_2, window_bounds = array<i64: 32, 32>}, {pipeline_mode = #tpu.pipeline_mode<synchronous>, transform_indices = @transform_3, window_bounds = array<i64: 32, 32>}, {pipeline_mode = #tpu.pipeline_mode<synchronous>, transform_indices = @transform_4, window_bounds = array<i64: 1, 32>}, {pipeline_mode = #tpu.pipeline_mode<synchronous>, transform_indices = @transform_5, window_bounds = array<i64: 1, 32>}, {pipeline_mode = #tpu.pipeline_mode<synchronous>, transform_indices = @transform_6, window_bounds = array<i64: 1, 32>}, {transform_indices = @transform_7, window_bounds = array<i64: 2, 8, 32>}]} {
    %c0 = arith.constant 0 : index
    %c0_0 = arith.constant 0 : index
    %c0_1 = arith.constant 0 : index
    %0 = vector.load %arg1[%c0, %c0_0, %c0_1] : memref<2x8x32xf32, #tpu.memory_space<vmem>>, vector<2x8x32xf32>
    %1 = vector.shape_cast %0 : vector<2x8x32xf32> to vector<16x32xf32>
    %c0_2 = arith.constant 0 : index
    %c0_3 = arith.constant 0 : index
    %2 = vector.load %arg2[%c0_2, %c0_3] : memref<32x32xf32, #tpu.memory_space<vmem>>, vector<32x32xf32>
    %cst = arith.constant dense<0.000000e+00> : vector<16x32xf32>
    %3 = tpu.matmul %1, %2, %cst {dimension_numbers = #tpu.dot_dimension_numbers<[1], [0], [0], [1], [0, 0, 1, 1], [], []>} : vector<16x32xf32>, vector<32x32xf32>, vector<16x32xf32> -> vector<16x32xf32>
    %c0_4 = arith.constant 0 : index
    %c0_5 = arith.constant 0 : index
    %4 = vector.load %arg5[%c0_4, %c0_5] : memref<1x32xf32, #tpu.memory_space<vmem>>, vector<1x32xf32>
    %5 = vector.broadcast %4 : vector<1x32xf32> to vector<16x32xf32>
    %6 = arith.addf %3, %5 : vector<16x32xf32>
    %c0_6 = arith.constant 0 : index
    %c0_7 = arith.constant 0 : index
    %7 = vector.load %arg3[%c0_6, %c0_7] : memref<32x32xf32, #tpu.memory_space<vmem>>, vector<32x32xf32>
    %cst_8 = arith.constant dense<0.000000e+00> : vector<16x32xf32>
    %8 = tpu.matmul %1, %7, %cst_8 {dimension_numbers = #tpu.dot_dimension_numbers<[1], [0], [0], [1], [0, 0, 1, 1], [], []>} : vector<16x32xf32>, vector<32x32xf32>, vector<16x32xf32> -> vector<16x32xf32>
    %c0_9 = arith.constant 0 : index
    %c0_10 = arith.constant 0 : index
    %9 = vector.load %arg6[%c0_9, %c0_10] : memref<1x32xf32, #tpu.memory_space<vmem>>, vector<1x32xf32>
    %10 = vector.broadcast %9 : vector<1x32xf32> to vector<16x32xf32>
    %11 = arith.addf %8, %10 : vector<16x32xf32>
    %c0_11 = arith.constant 0 : index
    %c0_12 = arith.constant 0 : index
    %12 = vector.load %arg4[%c0_11, %c0_12] : memref<32x32xf32, #tpu.memory_space<vmem>>, vector<32x32xf32>
    %cst_13 = arith.constant dense<0.000000e+00> : vector<16x32xf32>
    %13 = tpu.matmul %1, %12, %cst_13 {dimension_numbers = #tpu.dot_dimension_numbers<[1], [0], [0], [1], [0, 0, 1, 1], [], []>} : vector<16x32xf32>, vector<32x32xf32>, vector<16x32xf32> -> vector<16x32xf32>
    %c0_14 = arith.constant 0 : index
    %c0_15 = arith.constant 0 : index
    %14 = vector.load %arg7[%c0_14, %c0_15] : memref<1x32xf32, #tpu.memory_space<vmem>>, vector<1x32xf32>
    %15 = vector.broadcast %14 : vector<1x32xf32> to vector<16x32xf32>
    %16 = arith.addf %13, %15 : vector<16x32xf32>
    %17 = vector.shape_cast %6 : vector<16x32xf32> to vector<2x8x32xf32>
    %18 = vector.shape_cast %11 : vector<16x32xf32> to vector<2x8x32xf32>
    %19 = vector.shape_cast %16 : vector<16x32xf32> to vector<2x8x32xf32>
    "tpu.trace_start"() <{level = 10 : i32, message = "bqd,bkd->bqk"}> : () -> ()
    %cst_16 = arith.constant dense<0.000000e+00> : vector<2x8x8xf32>
    %20 = tpu.matmul %17, %18, %cst_16 {dimension_numbers = #tpu.dot_dimension_numbers<[2], [2], [1], [1], [0, 0, 0, 1, 1, 1], [0], [0]>} : vector<2x8x32xf32>, vector<2x8x32xf32>, vector<2x8x8xf32> -> vector<2x8x8xf32>
    "tpu.trace_stop"() : () -> ()
    %cst_17 = arith.constant dense<0xFF800000> : vector<2x8xf32>
    %21 = vector.multi_reduction <maximumf>, %20, %cst_17 [2] : vector<2x8x8xf32> to vector<2x8xf32>
    %22 = vector.shape_cast %21 : vector<2x8xf32> to vector<2x8x1xf32>
    %23 = vector.broadcast %22 : vector<2x8x1xf32> to vector<2x8x8xf32>
    %24 = arith.subf %20, %23 : vector<2x8x8xf32>
    %25 = math.exp %24 : vector<2x8x8xf32>
    %cst_18 = arith.constant dense<0.000000e+00> : vector<2x8xf32>
    %26 = vector.multi_reduction <add>, %25, %cst_18 [2] : vector<2x8x8xf32> to vector<2x8xf32>
    %27 = vector.shape_cast %26 : vector<2x8xf32> to vector<2x8x1xf32>
    %28 = tpu.reciprocal %27 : vector<2x8x1xf32> -> vector<2x8x1xf32>
    %29 = vector.broadcast %28 : vector<2x8x1xf32> to vector<2x8x8xf32>
    %30 = arith.mulf %25, %29 : vector<2x8x8xf32>
    "tpu.trace_start"() <{level = 10 : i32, message = "bqk,bkd->bqd"}> : () -> ()
    %cst_19 = arith.constant dense<0.000000e+00> : vector<2x8x32xf32>
    %31 = tpu.matmul %30, %19, %cst_19 {dimension_numbers = #tpu.dot_dimension_numbers<[2], [1], [1], [2], [0, 0, 0, 1, 1, 2], [0], [0]>} : vector<2x8x8xf32>, vector<2x8x32xf32>, vector<2x8x32xf32> -> vector<2x8x32xf32>
    "tpu.trace_stop"() : () -> ()
    %c0_20 = arith.constant 0 : index
    %c0_21 = arith.constant 0 : index
    %c0_22 = arith.constant 0 : index
    %32 = vector.load %arg8[%c0_20, %c0_21, %c0_22] : memref<2x8x32xf32, #tpu.memory_space<vmem>>, vector<2x8x32xf32>
    tpu.vector_store %arg8[%c0_20, %c0_21, %c0_22], %31 {strides = array<i32>} : memref<2x8x32xf32, #tpu.memory_space<vmem>>, vector<2x8x32xf32>,
    return
  }
  func.func @transform_0(%arg0: i32) -> (i32, i32, i32) {
    %c0_i32 = arith.constant 0 : i32
    %c0_i32_0 = arith.constant 0 : i32
    %c0_i32_1 = arith.constant 0 : i32
    return %arg0, %c0_i32, %c0_i32_0 : i32, i32, i32
  }
  func.func @transform_1(%arg0: i32) -> (i32, i32) {
    %c0_i32 = arith.constant 0 : i32
    %c0_i32_0 = arith.constant 0 : i32
    %c0_i32_1 = arith.constant 0 : i32
    return %c0_i32, %c0_i32_0 : i32, i32
  }
  func.func @transform_2(%arg0: i32) -> (i32, i32) {
    %c0_i32 = arith.constant 0 : i32
    %c0_i32_0 = arith.constant 0 : i32
    %c0_i32_1 = arith.constant 0 : i32
    return %c0_i32, %c0_i32_0 : i32, i32
  }
  func.func @transform_3(%arg0: i32) -> (i32, i32) {
    %c0_i32 = arith.constant 0 : i32
    %c0_i32_0 = arith.constant 0 : i32
    %c0_i32_1 = arith.constant 0 : i32
    return %c0_i32, %c0_i32_0 : i32, i32
  }
  func.func @transform_4(%arg0: i32) -> (i32, i32) {
    %c0_i32 = arith.constant 0 : i32
    %c0_i32_0 = arith.constant 0 : i32
    %c0_i32_1 = arith.constant 0 : i32
    return %c0_i32, %c0_i32_0 : i32, i32
  }
  func.func @transform_5(%arg0: i32) -> (i32, i32) {
    %c0_i32 = arith.constant 0 : i32
    %c0_i32_0 = arith.constant 0 : i32
    %c0_i32_1 = arith.constant 0 : i32
    return %c0_i32, %c0_i32_0 : i32, i32
  }
  func.func @transform_6(%arg0: i32) -> (i32, i32) {
    %c0_i32 = arith.constant 0 : i32
    %c0_i32_0 = arith.constant 0 : i32
    %c0_i32_1 = arith.constant 0 : i32
    return %c0_i32, %c0_i32_0 : i32, i32
  }
  func.func @transform_7(%arg0: i32) -> (i32, i32, i32) {
    %c0_i32 = arith.constant 0 : i32
    %c0_i32_0 = arith.constant 0 : i32
    %c0_i32_1 = arith.constant 0 : i32
    return %arg0, %c0_i32, %c0_i32_0 : i32, i32, i32
  }
}

</mosaic_0001>

<bundles_post_ra>
// kernel: tpu_custom_call.1
= control target key start
LH: loop header
LB: loop body
LE: loop exit
PB: predicated region body
PF: predicated region fallthrough
CT: control target
= control target key end

     0   :  { %12 = vsyncpa [#allocation3], 0  ;;  %s1020_s0 = inlined_call_operand.hbm [shape: f32[2,8,32], index: 0, kind: input, shape index: {}]   ;;  %s1021_s1 = inlined_call_operand.hbm [shape: f32[32,32], index: 1, kind: input, shape index: {}]   ;;  %s1022_s2 = inlined_call_operand.hbm [shape: f32[32,32], index: 2, kind: input, shape index: {}]   ;;  %s1023_s3 = inlined_call_operand.hbm [shape: f32[32,32], index: 3, kind: input, shape index: {}]   ;;  %s1024_s4 = inlined_call_operand.vmem [shape: f32[1,32], index: 4, kind: input, shape index: {}]   ;;  %s1025_s5 = inlined_call_operand.vmem [shape: f32[1,32], index: 5, kind: input, shape index: {}]   ;;  %s1026_s6 = inlined_call_operand.vmem [shape: f32[1,32], index: 6, kind: input, shape index: {}]   ;;  %s1027_s7 = inlined_call_operand.hbm [shape: f32[2,8,32], index: 7, kind: output, shape index: {}]  }
   0x1   :  { %13 = vsyncpa [#allocation6], 0 }
   0x2   :  { %14 = vsyncpa [#allocation9], 0 }
   0x3   :  { %15 = vsyncpa [#allocation4], 0  ;;  %s910_s24 = smov [#allocation5]   ;;  %s911_s26 = smov [#allocation2]  }
   0x4   :  { %s33_s25 = sshll.u32 %s910_s24, 4  ;;  %s21_s27 = sshll.u32 %s911_s26, 4  ;;  %s34_s25 = int_to_ptr.vmem [resolvable:$true] %s33_s25  ;;  %s22_s27 = int_to_ptr.vmem [resolvable:$true] %s21_s27 }
   0x5   :  { %s810_s28 = scalar_lea.vmem %s34_s25, 512  ;;  %p815_p1 = scmp.lt.s32.totalorder %s34_s25, %s34_s25 }
   0x6   :  { %p811_p0 = scmp.ne.s32.totalorder %s34_s25, %s810_s28  ;;  %p816_p2 = scmp.lt.s32.totalorder %s810_s28, %s810_s28 }
   0x8   :  { %p817_p3 = por %p816_p2, %p815_p1 }
   0xa   :  { %p818_p4 = pnand %p817_p3, %p811_p0 }
   0xc   :  { %821 = shalt.err (!%p818_p4)
}
   0xd   :  { %s912_s29 = smov 128   ;;  %s913_s30 = smov 8  }
   0xe   :  { %39 = dma.hbm_to_vmem [thread:$0]  %s1021_s1, 512, %s34_s25, [#allocation6], %s912_s29, %s912_s29, %s913_s30  }
   0xf   :  { %s830_s10 = scalar_lea.vmem %s22_s27, 256  ;;  %p835_p6 = scmp.lt.s32.totalorder %s22_s27, %s22_s27 }
  0x10   :  { %p831_p5 = scmp.ne.s32.totalorder %s22_s27, %s830_s10  ;;  %p836_p7 = scmp.lt.s32.totalorder %s830_s10, %s830_s10 }
  0x12   :  { %p837_p8 = por %p836_p7, %p835_p6 }
  0x14   :  { %p838_p9 = pnand %p837_p8, %p831_p5 }
  0x16   :  { %841 = shalt.err (!%p838_p9)
}
  0x17   :  { %27 = dma.hbm_to_vmem [thread:$0]  %s1020_s0, 256, %s22_s27, [#allocation3], %s912_s29, %s912_s29, %s913_s30  }
  0x18   :  { %s914_s13 = smov [#allocation7]   ;;  %s915_s15 = smov [#allocation8]  }
  0x19   :  { %s45_s14 = sshll.u32 %s914_s13, 4  ;;  %s57_s16 = sshll.u32 %s915_s15, 4  ;;  %s46_s14 = int_to_ptr.vmem [resolvable:$true] %s45_s14  ;;  %s58_s16 = int_to_ptr.vmem [resolvable:$true] %s57_s16 }
  0x1a   :  { %s850_s1 = scalar_lea.vmem %s46_s14, 512  ;;  %p855_p11 = scmp.lt.s32.totalorder %s46_s14, %s46_s14 }
  0x1b   :  { %p851_p10 = scmp.ne.s32.totalorder %s46_s14, %s850_s1  ;;  %p856_p12 = scmp.lt.s32.totalorder %s850_s1, %s850_s1 }
  0x1d   :  { %p857_p13 = por %p856_p12, %p855_p11 }
  0x1f   :  { %p858_p0 = pnand %p857_p13, %p851_p10 }
  0x21   :  { %861 = shalt.err (!%p858_p0)
}
  0x22   :  { %51 = dma.hbm_to_vmem [thread:$0]  %s1022_s2, 512, %s46_s14, [#allocation6], %s912_s29, %s912_s29, %s913_s30  }
  0x23   :  { %s870_s0 = scalar_lea.vmem %s58_s16, 512  ;;  %p875_p2 = scmp.lt.s32.totalorder %s58_s16, %s58_s16 }
  0x24   :  { %p871_p1 = scmp.ne.s32.totalorder %s58_s16, %s870_s0  ;;  %p876_p3 = scmp.lt.s32.totalorder %s870_s0, %s870_s0 }
  0x26   :  { %p877_p4 = por %p876_p3, %p875_p2 }
  0x28   :  { %p878_p5 = pnand %p877_p4, %p871_p1 }
  0x2a   :  { %881 = shalt.err (!%p878_p5)
}
  0x2b   :  { %63 = dma.hbm_to_vmem [thread:$0]  %s1023_s3, 512, %s58_s16, [#allocation9], %s912_s29, %s912_s29, %s913_s30  }
  0x2c   :  { %902 = dma.done.wait [#allocation3], 256  }
  0x2d   :  { %903 = vsyncadd [#allocation3], 4294967040 }
  0x2e   :  { %904 = dma.done.wait [#allocation6], 1024  }
  0x2f   :  { %905 = vsyncadd [#allocation6], 4294966272 }
  0x30   :  { %906 = dma.done.wait [#allocation9], 512  }
  0x31   :  { %907 = vsyncadd [#allocation9], 4294966784  ;;  %v180_v0 = vld [vmem:[#allocation7 + $0x18] sm:$0xff]  ;;  %v179_v2 = vld [vmem:[#allocation7 + $0x10] sm:$0xff]  ;;  %vm95_vm0 = vcmask 261120   ;;  %v916_v10 = vmov 0.0  }
  0x32   :  { %v87_v1 = vld [vmem:[#allocation5 + $0x18] sm:$0xff]  ;;  %743 = vmatprep.subr.mxu1 %v180_v0  ;;  %v86_v3 = vld [vmem:[#allocation5 + $0x10] sm:$0xff]  ;;  %v178_v4 = vld [vmem:[#allocation7 + $0x8] sm:$0xff]  ;;  %vm917_vm1 = vmmov 0   ;;  %vm501_vm2 = vcmask 64512   ;;  %s918_s23 = smov [#allocation10]  }
  0x33   :  { %732 = vmatprep.subr.mxu0 %v87_v1  ;;  %744 = vmatpush3.msra.mxu1 %v180_v0  ;;  %v85_v5 = vld [vmem:[#allocation5 + $0x8] sm:$0xff]  ;;  %v177_v6 = vld [vmem:[#allocation7] sm:$0xff]  ;;  %v82_v7 = vld [vmem:[#allocation2] sm:$0xff] }
  0x34   :  { %733 = vmatpush3.msra.mxu0 %v87_v1  ;;  %745 = vmatprep.subr.mxu1 %v179_v2  ;;  %v84_v8 = vld [vmem:[#allocation5] sm:$0xff]  ;;  %v83_v9 = vld [vmem:[#allocation2 + $0x8] sm:$0xff]  ;;  %v694_v12 = vld [vmem:[%s1025_s5] ss:$0 sm:$0xff] }
  0x35   :  { %734 = vmatprep.subr.mxu0 %v86_v3  ;;  %746 = vmatpush3.msra.mxu1 %v179_v2  ;;  %v691_v15 = vld [vmem:[%s1024_s4] ss:$0 sm:$0xff]  ;;  %v266_v21 = vld [vmem:[#allocation8 + $0x18] sm:$0xff]  ;;  %v264_v23 = vld [vmem:[#allocation8 + $0x8] sm:$0xff] }
  0x36   :  { %735 = vmatpush3.msra.mxu0 %v86_v3  ;;  %747 = vmatprep.subr.mxu1 %v178_v4  ;;  %v265_v22 = vld [vmem:[#allocation8 + $0x10] sm:$0xff]  ;;  %v263_v24 = vld [vmem:[#allocation8] sm:$0xff] }
  0x37   :  { %736 = vmatprep.subr.mxu0 %v85_v5  ;;  %748 = vmatpush3.msra.mxu1 %v178_v4  ;;  %v697_v42 = vld [vmem:[%s1026_s6] ss:$0 sm:$0xff]  ;;  %s677_s6 = sshll.u32 %s918_s23, 4  ;;  %s678_s6 = int_to_ptr.vmem [resolvable:$true] %s677_s6 }
  0x38   :  { %737 = vmatpush3.msra.mxu0 %v85_v5  ;;  %749 = vmatprep.subr.mxu1 %v177_v6  ;;  %s882_s24 = scalar_lea.vmem %s678_s6, 256  ;;  %p887_p7 = scmp.lt.s32.totalorder %s678_s6, %s678_s6 }
  0x39   :  { %751 = vmatprep.mubr.msk.f32.mxu1 %vm95_vm0, %v82_v7  ;;  %750 = vmatpush3.msra.mxu1 %v177_v6  ;;  %p883_p6 = scmp.ne.s32.totalorder %s678_s6, %s882_s24  ;;  %p888_p8 = scmp.lt.s32.totalorder %s882_s24, %s882_s24 }
  0x3a   :  { %738 = vmatprep.subr.mxu0 %v84_v8  ;;  %752 = vmatmul.mubr.msk.f32.vlgmr.msra.gmra.mxu1 %vm95_vm0, %v83_v9 }
  0x3b   :  { %739 = vmatpush3.msra.mxu0 %v84_v8  ;;  %740 = vmatprep.mubr.msk.f32.mxu0 %vm95_vm0, %v82_v7  ;;  %p889_p9 = por %p888_p8, %p887_p7 }
  0x3c   :  { %741 = vmatmul.mubr.msk.f32.vlgmr.msra.gmra.mxu0 %vm95_vm0, %v83_v9  ;;  %765 = vmatprep.subr.mxu1 %v916_v10 }
  0x3d   :  { %762 = vmatprep.mubr.msk.f32.mxu0 %vm95_vm0, %v82_v7  ;;  %767 = vmatprep.mubr.msk.f32.mxu1 %vm917_vm1, %v916_v10  ;;  %p890_p10 = pnand %p889_p9, %p883_p6 }
  0x3e   :  { %754 = vmatprep.subr.mxu0 %v266_v21 }
  0x3f   :  { %755 = vmatpush3.msra.mxu0 %v266_v21 }
  0x40   :  { %756 = vmatprep.subr.mxu0 %v265_v22 }
  0x41   :  { %757 = vmatpush3.msra.mxu0 %v265_v22 }
  0x42   :  { %758 = vmatprep.subr.mxu0 %v264_v23 }
  0x43   :  { %759 = vmatpush3.msra.mxu0 %v264_v23 }
  0x44   :  { %760 = vmatprep.subr.mxu0 %v263_v24 }
  0x45   :  { %761 = vmatpush3.msra.mxu0 %v263_v24 }
  0x46   :  { %763 = vmatmul.mubr.msk.f32.vlgmr.msra.gmra.mxu0 %vm95_vm0, %v83_v9  ;;  %775 = vmatprep.subr.mxu0 %v916_v10 }
  0x47   :  { %777 = vmatprep.mubr.msk.f32.mxu0 %vm917_vm1, %v916_v10 }
  0xfa   :  { %v753_v11 = vpop.f32.mrf.mxu1 }
  0xfb   :  { %v260_v19 = vadd.f32 %v753_v11, %v694_v12 }
  0xfc   :  { %v742_v13 = vpop.f32.mrf.mxu0  ;;  %v254_v14 = vpop.f32.mrf.mxu1 }
  0xfd   :  { %v255_v16 = vadd.f32 %v694_v12, %v254_v14  ;;  %v174_v20 = vadd.f32 %v742_v13, %v691_v15 }
  0xfe   :  { %v168_v17 = vpop.f32.mrf.mxu0 }
  0xff   :  { %766 = vmatpush3.xpose.msk.msra.mxu1 %vm95_vm0, %v255_v16  ;;  %v169_v18 = vadd.f32 %v691_v15, %v168_v17 }
 0x100   :  { %770 = vmatprep.subr.mxu1 %v916_v10 }
 0x102   :  { %768 = vmatmul.mubr.msk.f32.vlgmr.msra.gmra.mxu1 %vm95_vm0, %v169_v18 }
 0x103   :  { %771 = vmatpush3.xpose.msk.msra.mxu1 %vm95_vm0, %v260_v19  ;;  %772 = vmatprep.mubr.msk.f32.mxu1 %vm917_vm1, %v916_v10 }
 0x104   :  { %780 = vmatprep.subr.mxu1 %v916_v10 }
 0x106   :  { %773 = vmatmul.mubr.msk.f32.vlgmr.msra.gmra.mxu1 %vm95_vm0, %v174_v20  ;;  %v764_v41 = vpop.f32.mrf.mxu0 }
 0x107   :  { %782 = vmatprep.mubr.msk.f32.mxu1 %vm917_vm1, %v916_v10  ;;  %v346_v43 = vadd.f32 %v764_v41, %v697_v42 }
 0x108   :  { %v340_v44 = vpop.f32.mrf.mxu0 }
 0x109   :  { %v341_v45 = vadd.f32 %v697_v42, %v340_v44  ;;  %781 = vmatpush3.msra.mxu1 %v346_v43 }
 0x10b   :  { %776 = vmatpush3.msra.mxu0 %v341_v45 }
 0x1c2   :  { %v421_v25 = vpop.f32.mrf.mxu1 }
 0x1c3   :  { %v502_v26 = vsel %vm501_vm2, %v421_v25, -inf }
 0x1c4   :  { %503 = vmax.xlane.f32.xlu0 %v502_v26  ;;  %v769_v27 = vpop.f32.mrf.mxu1 }
 0x1c6   :  { %v497_v28 = vpop.f32.mrf.mxu1 }
 0x1c7   :  { %v505_v29 = vsel %vm501_vm2, %v497_v28, -inf }
 0x1c8   :  { %506 = vmax.xlane.f32.xlu0 %v505_v29  ;;  %v774_v30 = vpop.f32.mrf.mxu1 }
 0x24d   :  { %v504_v31 = vpop.xlane.xlu0 %503 }
 0x24e   :  { %v508_v32 = vsub.f32 %v421_v25, %v504_v31 }
 0x250   :  { %v510_v33 = vmul.f32 1.442695, %v508_v32 }
 0x251   :  { %v507_v34 = vpop.xlane.xlu0 %506 }
 0x252   :  { %794 = vpow2.f32 %v510_v33  ;;  %v509_v35 = vsub.f32 %v497_v28, %v507_v34 }
 0x254   :  { %v512_v36 = vmul.f32 1.442695, %v509_v35 }
 0x256   :  { %796 = vpow2.f32 %v512_v36 }
 0x25f   :  { %v795_v37 = vpop.eup %794 }
 0x260   :  { %v514_v38 = vsel %vm501_vm2, %v795_v37, 0.0 }
 0x261   :  { %515 = vadd.xlane.f32.xlu1 %v514_v38 }
 0x263   :  { %v797_v39 = vpop.eup %796 }
 0x264   :  { %v517_v40 = vsel %vm501_vm2, %v797_v39, 0.0 }
 0x265   :  { %518 = vadd.xlane.f32.xlu1 %v517_v40 }
 0x2ea   :  { %v516_v46 = vpop.xlane.xlu1 %515 }
 0x2eb   :  { %798 = vrcp.f32 %v516_v46 }
 0x2ee   :  { %v519_v47 = vpop.xlane.xlu1 %518 }
 0x2ef   :  { %800 = vrcp.f32 %v519_v47 }
 0x2f8   :  { %v799_v48 = vpop.eup %798 }
 0x2f9   :  { %v522_v49 = vmul.f32 %v799_v48, %v795_v37 }
 0x2fb   :  { %778 = vmatmul.mubr.msk.f32.vlgmr.msra.gmra.mxu0 %vm501_vm2, %v522_v49 }
 0x2fc   :  { %v801_v50 = vpop.eup %800 }
 0x2fd   :  { %v523_v51 = vmul.f32 %v801_v50, %v797_v39 }
 0x2ff   :  { %783 = vmatmul.mubr.msk.f32.vlgmr.msra.gmra.mxu1 %vm501_vm2, %v523_v51 }
 0x3bb   :  { %v593_v52 = vpop.f32.mrf.mxu0 }
 0x3bc   :  { %670 = vst.msk [vmem:[#allocation10] sm:$0xff] %vm95_vm0, %v593_v52 }
 0x3bd   :  { %v779_v53 = vpop.f32.mrf.mxu0 }
 0x3bf   :  { %v666_v54 = vpop.f32.mrf.mxu1 }
 0x3c0   :  { %671 = vst.msk [vmem:[#allocation10 + $0x8] sm:$0xff] %vm95_vm0, %v666_v54 }
 0x3c1   :  { %v784_v55 = vpop.f32.mrf.mxu1 }
 0x3c2   :  { %893 = shalt.err (!%p890_p10)
}
 0x3c3   :  { %683 = dma.vmem_to_hbm [thread:$0]  %s678_s6, 256, %s1027_s7, [#allocation4], %s912_s29, %s912_s29, %s913_s30  }
 0x3c4   :  { %908 = dma.done.wait [#allocation4], 256  }
 0x3c5   :  { %909 = vsyncadd [#allocation4], 4294967040 }
 0x3c6   :  { %687 = vsyncpa [#allocation3], 1 }
 0x3c7   :  { %688 = vsyncpa [#allocation6], 1 }
 0x3c8   :  { %689 = vsyncpa [#allocation9], 1 }
 0x3c9   :  { %690 = vsyncpa [#allocation4], 1 }

</bundles_post_ra>
